<compile_context>
chip_gen: v7x
topology: tpu7x:2x2x1
jax: 0.10.0
libtpu: 0.0.40
codegen_flags: <defaults>
</compile_context>

<pallas_src>
import functools

import jax
import jax.numpy as jnp
from jax.experimental import pallas as pl
from jax.experimental.pallas import tpu as pltpu


def _round_up(x, m):
    return (x + m - 1) // m * m


# ----------------------------------------------------------------------------
# Pallas kernel: fused matmul + bias (+ optional ReLU), M-tiled.
# ----------------------------------------------------------------------------
def _matmul_bias_act_kernel(x_ref, w_ref, b_ref, o_ref, *, relu):
    acc = jnp.dot(x_ref[...], w_ref[...], preferred_element_type=jnp.float32)
    acc = acc + b_ref[...]                       # (1, Np) broadcasts over rows
    if relu:
        acc = jnp.maximum(acc, 0.0)
    o_ref[...] = acc.astype(o_ref.dtype)


def matmul_bias_act(x, w, b, *, relu, out_dtype=jnp.float32, tm=256):
    """x: [M, K], w: [K, N], b: [N] -> [M, N] in `out_dtype`.

    M-tiled Pallas matmul: row tiles of x stream through VMEM (double-buffered
    by the Pallas pipeline) while the small weight/bias blocks stay resident.
    MXU runs on bf16 inputs with f32 accumulation; bias + ReLU are fused on
    the f32 accumulator inside the kernel.
    """
    M, K = x.shape
    K2, N = w.shape
    assert K == K2 and b.shape == (N,)

    Kp = _round_up(K, 16)                 # bf16 sublane packing for the K dim
    Np = _round_up(N, 128)                # lane-dense outputs (no masked vst)
    tm = min(tm, _round_up(M, 16))        # tile multiple of 16, capped at 256
    Mp = _round_up(M, tm)

    x_p = jnp.pad(x.astype(jnp.bfloat16), ((0, Mp - M), (0, Kp - K)))
    w_p = jnp.pad(w.astype(jnp.bfloat16), ((0, Kp - K), (0, Np - N)))
    b_p = jnp.pad(b.astype(jnp.float32), (0, Np - N)).reshape(1, Np)

    out = pl.pallas_call(
        functools.partial(_matmul_bias_act_kernel, relu=relu),
        out_shape=jax.ShapeDtypeStruct((Mp, Np), out_dtype),
        grid=(Mp // tm,),
        in_specs=[
            pl.BlockSpec((tm, Kp), lambda i: (i, 0)),   # streamed row tiles
            pl.BlockSpec((Kp, Np), lambda i: (0, 0)),   # weights resident
            pl.BlockSpec((1, Np), lambda i: (0, 0)),    # bias resident
        ],
        out_specs=pl.BlockSpec((tm, Np), lambda i: (i, 0)),
        compiler_params=pltpu.CompilerParams(
            dimension_semantics=("parallel",),          # megacore / v7x 2 TCs
            vmem_limit_bytes=32 * 1024 * 1024,
        ),
    )(x_p, w_p, b_p)
    return out[:M, :N]


# ----------------------------------------------------------------------------
# Glue: im2col (pure data rearrangement), adaptive average pool
# ----------------------------------------------------------------------------
def im2col(x, kh, kw, stride):
    """x: [N, H, W, C] -> ([N*Ho*Wo, kh*kw*C], Ho, Wo). K-axis order: (kh, kw, c)."""
    N, H, W, C = x.shape
    Ho = (H - kh) // stride + 1
    Wo = (W - kw) // stride + 1
    patches = []
    for i in range(kh):
        for j in range(kw):
            patches.append(x[:, i:i + stride * Ho:stride, j:j + stride * Wo:stride, :])
    p = jnp.concatenate(patches, axis=-1)            # [N, Ho, Wo, kh*kw*C]
    return p.reshape(N * Ho * Wo, kh * kw * C), Ho, Wo


def conv2d_relu(x, w, b, stride, relu=True):
    """x: [N, H, W, Cin] NHWC, w: [KH, KW, Cin, Cout], b: [Cout] -> bf16 NHWC."""
    KH, KW, Cin, Cout = w.shape
    N = x.shape[0]
    patches, Ho, Wo = im2col(x, KH, KW, stride)
    w_mat = w.reshape(KH * KW * Cin, Cout)
    out = matmul_bias_act(patches, w_mat, b, relu=relu,
                          out_dtype=jnp.bfloat16)     # Pallas hot path
    return out.reshape(N, Ho, Wo, Cout)


def adaptive_avg_pool2d(x, out_size):
    """PyTorch-semantics AdaptiveAvgPool2d on NHWC input. x: [N, H, W, C]."""
    N, H, W, C = x.shape
    oh = ow = out_size
    if H % oh == 0 and W % ow == 0:
        bh, bw = H // oh, W // ow                    # single fused reduction
        return x.reshape(N, oh, bh, ow, bw, C).mean(axis=(2, 4))
    # Fallback for non-divisible sizes: PyTorch floor/ceil bin edges.
    rows = []
    for i in range(oh):
        h0 = (i * H) // oh
        h1 = -(-((i + 1) * H) // oh)
        cols = []
        for j in range(ow):
            w0 = (j * W) // ow
            w1 = -(-((j + 1) * W) // ow)
            cols.append(jnp.mean(x[:, h0:h1, w0:w1, :], axis=(1, 2)))
        rows.append(jnp.stack(cols, axis=1))          # [N, ow, C]
    return jnp.stack(rows, axis=1)                    # [N, oh, ow, C]


# ----------------------------------------------------------------------------
# Teacher forward
# ----------------------------------------------------------------------------
def init_params(key):
    ks = jax.random.split(key, 8)

    def uniform(k, shape, fan_in):
        bound = 1.0 / jnp.sqrt(fan_in)
        return jax.random.uniform(k, shape, jnp.float32, -bound, bound)

    params = {
        # conv weights stored as [KH, KW, Cin, Cout] (HWIO)
        "w1": uniform(ks[0], (3, 3, 3, 128), 3 * 3 * 3),
        "b1": uniform(ks[1], (128,), 3 * 3 * 3),
        "w2": uniform(ks[2], (3, 3, 128, 128), 3 * 3 * 128),
        "b2": uniform(ks[3], (128,), 3 * 3 * 128),
        "w3": uniform(ks[4], (2, 2, 128, 128), 2 * 2 * 128),
        "b3": uniform(ks[5], (128,), 2 * 2 * 128),
        # fc stored as [512, 10] (transpose of PyTorch's [10, 512]), row order (c,h,w)
        "wf": uniform(ks[6], (512, 10), 512),
        "bf": uniform(ks[7], (10,), 512),
    }
    return params


def teacher_forward(params, x_nchw):
    """x_nchw: [N, 3, H, W] float32 -> logits [N, 10] float32."""
    x = jnp.transpose(x_nchw, (0, 2, 3, 1))          # NCHW -> NHWC
    x = conv2d_relu(x, params["w1"], params["b1"], stride=2, relu=True)
    x = conv2d_relu(x, params["w2"], params["b2"], stride=2, relu=True)
    x = conv2d_relu(x, params["w3"], params["b3"], stride=1, relu=True)
    x = adaptive_avg_pool2d(x, 2)                    # [N, 2, 2, 128]
    # PyTorch flatten is over (C, H, W): transpose back to NCHW order first.
    x = jnp.transpose(x, (0, 3, 1, 2)).reshape(x.shape[0], -1)   # [N, 512]
    logits = matmul_bias_act(x, params["wf"], params["bf"],
                             relu=False, out_dtype=jnp.float32)
    return logits


if __name__ == "__main__":
    key = jax.random.PRNGKey(0)
    pkey, xkey = jax.random.split(key)
    params = init_params(pkey)

    # Input: batch=2, channels=3 (module's conv expects 3), spatial=16.
    # 16 -> conv(3,s2) 7 -> conv(3,s2) 3 -> conv(2,s1) 2 -> pool(2) 2 -> 128*2*2=512
    x = jax.random.normal(xkey, (2, 3, 16, 16), jnp.float32)

    fwd = jax.jit(teacher_forward)
    out = jax.block_until_ready(fwd(params, x))
    assert out.shape == (2, 10), out.shape
    print("KERNEL_OK")
</pallas_src>

<mosaic_0001>
module attributes {stable_mosaic.version = 11 : i64} {
  func.func @_matmul_bias_act_kernel(%arg0: i32, %arg1: memref<112x32xbf16, #tpu.memory_space<vmem>>, %arg2: memref<32x128xbf16, #tpu.memory_space<vmem>>, %arg3: memref<1x128xf32, #tpu.memory_space<vmem>>, %arg4: memref<112x128xbf16, #tpu.memory_space<vmem>>) attributes {dimension_semantics = [#tpu.dimension_semantics<parallel>], iteration_bounds = array<i64: 1>, scalar_prefetch = 0 : i64, scratch_operands = 0 : i64, tpu.core_type = #tpu.core_type<tc>, window_params = [{transform_indices = @transform_0, window_bounds = array<i64: 112, 32>}, {pipeline_mode = #tpu.pipeline_mode<synchronous>, transform_indices = @transform_1, window_bounds = array<i64: 32, 128>}, {pipeline_mode = #tpu.pipeline_mode<synchronous>, transform_indices = @transform_2, window_bounds = array<i64: 1, 128>}, {transform_indices = @transform_3, window_bounds = array<i64: 112, 128>}]} {
    %c0 = arith.constant 0 : index
    %c0_0 = arith.constant 0 : index
    %0 = vector.load %arg1[%c0, %c0_0] : memref<112x32xbf16, #tpu.memory_space<vmem>>, vector<112x32xbf16>
    %c0_1 = arith.constant 0 : index
    %c0_2 = arith.constant 0 : index
    %1 = vector.load %arg2[%c0_1, %c0_2] : memref<32x128xbf16, #tpu.memory_space<vmem>>, vector<32x128xbf16>
    %cst = arith.constant dense<0.000000e+00> : vector<112x128xf32>
    %2 = tpu.matmul %0, %1, %cst {dimension_numbers = #tpu.dot_dimension_numbers<[1], [0], [0], [1], [0, 0, 1, 1], [], []>} : vector<112x32xbf16>, vector<32x128xbf16>, vector<112x128xf32> -> vector<112x128xf32>
    %c0_3 = arith.constant 0 : index
    %c0_4 = arith.constant 0 : index
    %3 = vector.load %arg3[%c0_3, %c0_4] : memref<1x128xf32, #tpu.memory_space<vmem>>, vector<1x128xf32>
    %4 = vector.broadcast %3 : vector<1x128xf32> to vector<112x128xf32>
    %5 = arith.addf %2, %4 : vector<112x128xf32>
    %cst_5 = arith.constant 0.000000e+00 : f32
    %6 = vector.broadcast %cst_5 : f32 to vector<112x128xf32>
    %7 = arith.maximumf %5, %6 : vector<112x128xf32>
    %8 = arith.truncf %7 : vector<112x128xf32> to vector<112x128xbf16>
    %c0_6 = arith.constant 0 : index
    %c0_7 = arith.constant 0 : index
    %9 = vector.load %arg4[%c0_6, %c0_7] : memref<112x128xbf16, #tpu.memory_space<vmem>>, vector<112x128xbf16>
    tpu.vector_store %arg4[%c0_6, %c0_7], %8 {strides = array<i32>} : memref<112x128xbf16, #tpu.memory_space<vmem>>, vector<112x128xbf16>,
    return
  }
  func.func @transform_0(%arg0: i32) -> (i32, i32) {
    %c0_i32 = arith.constant 0 : i32
    %c0_i32_0 = arith.constant 0 : i32
    return %arg0, %c0_i32 : i32, i32
  }
  func.func @transform_1(%arg0: i32) -> (i32, i32) {
    %c0_i32 = arith.constant 0 : i32
    %c0_i32_0 = arith.constant 0 : i32
    %c0_i32_1 = arith.constant 0 : i32
    return %c0_i32, %c0_i32_0 : i32, i32
  }
  func.func @transform_2(%arg0: i32) -> (i32, i32) {
    %c0_i32 = arith.constant 0 : i32
    %c0_i32_0 = arith.constant 0 : i32
    %c0_i32_1 = arith.constant 0 : i32
    return %c0_i32, %c0_i32_0 : i32, i32
  }
  func.func @transform_3(%arg0: i32) -> (i32, i32) {
    %c0_i32 = arith.constant 0 : i32
    %c0_i32_0 = arith.constant 0 : i32
    return %arg0, %c0_i32 : i32, i32
  }
}

module attributes {stable_mosaic.version = 11 : i64} {
  func.func @_matmul_bias_act_kernel(%arg0: i32, %arg1: memref<32x1152xbf16, #tpu.memory_space<vmem>>, %arg2: memref<1152x128xbf16, #tpu.memory_space<vmem>>, %arg3: memref<1x128xf32, #tpu.memory_space<vmem>>, %arg4: memref<32x128xbf16, #tpu.memory_space<vmem>>) attributes {dimension_semantics = [#tpu.dimension_semantics<parallel>], iteration_bounds = array<i64: 1>, scalar_prefetch = 0 : i64, scratch_operands = 0 : i64, tpu.core_type = #tpu.core_type<tc>, window_params = [{transform_indices = @transform_0, window_bounds = array<i64: 32, 1152>}, {pipeline_mode = #tpu.pipeline_mode<synchronous>, transform_indices = @transform_1, window_bounds = array<i64: 1152, 128>}, {pipeline_mode = #tpu.pipeline_mode<synchronous>, transform_indices = @transform_2, window_bounds = array<i64: 1, 128>}, {transform_indices = @transform_3, window_bounds = array<i64: 32, 128>}]} {
    %c0 = arith.constant 0 : index
    %c0_0 = arith.constant 0 : index
    %0 = vector.load %arg1[%c0, %c0_0] : memref<32x1152xbf16, #tpu.memory_space<vmem>>, vector<32x1152xbf16>
    %c0_1 = arith.constant 0 : index
    %c0_2 = arith.constant 0 : index
    %1 = vector.load %arg2[%c0_1, %c0_2] : memref<1152x128xbf16, #tpu.memory_space<vmem>>, vector<1152x128xbf16>
    %cst = arith.constant dense<0.000000e+00> : vector<32x128xf32>
    %2 = tpu.matmul %0, %1, %cst {dimension_numbers = #tpu.dot_dimension_numbers<[1], [0], [0], [1], [0, 0, 1, 1], [], []>} : vector<32x1152xbf16>, vector<1152x128xbf16>, vector<32x128xf32> -> vector<32x128xf32>
    %c0_3 = arith.constant 0 : index
    %c0_4 = arith.constant 0 : index
    %3 = vector.load %arg3[%c0_3, %c0_4] : memref<1x128xf32, #tpu.memory_space<vmem>>, vector<1x128xf32>
    %4 = vector.broadcast %3 : vector<1x128xf32> to vector<32x128xf32>
    %5 = arith.addf %2, %4 : vector<32x128xf32>
    %cst_5 = arith.constant 0.000000e+00 : f32
    %6 = vector.broadcast %cst_5 : f32 to vector<32x128xf32>
    %7 = arith.maximumf %5, %6 : vector<32x128xf32>
    %8 = arith.truncf %7 : vector<32x128xf32> to vector<32x128xbf16>
    %c0_6 = arith.constant 0 : index
    %c0_7 = arith.constant 0 : index
    %9 = vector.load %arg4[%c0_6, %c0_7] : memref<32x128xbf16, #tpu.memory_space<vmem>>, vector<32x128xbf16>
    tpu.vector_store %arg4[%c0_6, %c0_7], %8 {strides = array<i32>} : memref<32x128xbf16, #tpu.memory_space<vmem>>, vector<32x128xbf16>,
    return
  }
  func.func @transform_0(%arg0: i32) -> (i32, i32) {
    %c0_i32 = arith.constant 0 : i32
    %c0_i32_0 = arith.constant 0 : i32
    return %arg0, %c0_i32 : i32, i32
  }
  func.func @transform_1(%arg0: i32) -> (i32, i32) {
    %c0_i32 = arith.constant 0 : i32
    %c0_i32_0 = arith.constant 0 : i32
    %c0_i32_1 = arith.constant 0 : i32
    return %c0_i32, %c0_i32_0 : i32, i32
  }
  func.func @transform_2(%arg0: i32) -> (i32, i32) {
    %c0_i32 = arith.constant 0 : i32
    %c0_i32_0 = arith.constant 0 : i32
    %c0_i32_1 = arith.constant 0 : i32
    return %c0_i32, %c0_i32_0 : i32, i32
  }
  func.func @transform_3(%arg0: i32) -> (i32, i32) {
    %c0_i32 = arith.constant 0 : i32
    %c0_i32_0 = arith.constant 0 : i32
    return %arg0, %c0_i32 : i32, i32
  }
}

module attributes {stable_mosaic.version = 11 : i64} {
  func.func @_matmul_bias_act_kernel(%arg0: i32, %arg1: memref<16x512xbf16, #tpu.memory_space<vmem>>, %arg2: memref<512x128xbf16, #tpu.memory_space<vmem>>, %arg3: memref<1x128xf32, #tpu.memory_space<vmem>>, %arg4: memref<16x128xbf16, #tpu.memory_space<vmem>>) attributes {dimension_semantics = [#tpu.dimension_semantics<parallel>], iteration_bounds = array<i64: 1>, scalar_prefetch = 0 : i64, scratch_operands = 0 : i64, tpu.core_type = #tpu.core_type<tc>, window_params = [{transform_indices = @transform_0, window_bounds = array<i64: 16, 512>}, {pipeline_mode = #tpu.pipeline_mode<synchronous>, transform_indices = @transform_1, window_bounds = array<i64: 512, 128>}, {pipeline_mode = #tpu.pipeline_mode<synchronous>, transform_indices = @transform_2, window_bounds = array<i64: 1, 128>}, {transform_indices = @transform_3, window_bounds = array<i64: 16, 128>}]} {
    %c0 = arith.constant 0 : index
    %c0_0 = arith.constant 0 : index
    %0 = vector.load %arg1[%c0, %c0_0] : memref<16x512xbf16, #tpu.memory_space<vmem>>, vector<16x512xbf16>
    %c0_1 = arith.constant 0 : index
    %c0_2 = arith.constant 0 : index
    %1 = vector.load %arg2[%c0_1, %c0_2] : memref<512x128xbf16, #tpu.memory_space<vmem>>, vector<512x128xbf16>
    %cst = arith.constant dense<0.000000e+00> : vector<16x128xf32>
    %2 = tpu.matmul %0, %1, %cst {dimension_numbers = #tpu.dot_dimension_numbers<[1], [0], [0], [1], [0, 0, 1, 1], [], []>} : vector<16x512xbf16>, vector<512x128xbf16>, vector<16x128xf32> -> vector<16x128xf32>
    %c0_3 = arith.constant 0 : index
    %c0_4 = arith.constant 0 : index
    %3 = vector.load %arg3[%c0_3, %c0_4] : memref<1x128xf32, #tpu.memory_space<vmem>>, vector<1x128xf32>
    %4 = vector.broadcast %3 : vector<1x128xf32> to vector<16x128xf32>
    %5 = arith.addf %2, %4 : vector<16x128xf32>
    %cst_5 = arith.constant 0.000000e+00 : f32
    %6 = vector.broadcast %cst_5 : f32 to vector<16x128xf32>
    %7 = arith.maximumf %5, %6 : vector<16x128xf32>
    %8 = arith.truncf %7 : vector<16x128xf32> to vector<16x128xbf16>
    %c0_6 = arith.constant 0 : index
    %c0_7 = arith.constant 0 : index
    %9 = vector.load %arg4[%c0_6, %c0_7] : memref<16x128xbf16, #tpu.memory_space<vmem>>, vector<16x128xbf16>
    tpu.vector_store %arg4[%c0_6, %c0_7], %8 {strides = array<i32>} : memref<16x128xbf16, #tpu.memory_space<vmem>>, vector<16x128xbf16>,
    return
  }
  func.func @transform_0(%arg0: i32) -> (i32, i32) {
    %c0_i32 = arith.constant 0 : i32
    %c0_i32_0 = arith.constant 0 : i32
    return %arg0, %c0_i32 : i32, i32
  }
  func.func @transform_1(%arg0: i32) -> (i32, i32) {
    %c0_i32 = arith.constant 0 : i32
    %c0_i32_0 = arith.constant 0 : i32
    %c0_i32_1 = arith.constant 0 : i32
    return %c0_i32, %c0_i32_0 : i32, i32
  }
  func.func @transform_2(%arg0: i32) -> (i32, i32) {
    %c0_i32 = arith.constant 0 : i32
    %c0_i32_0 = arith.constant 0 : i32
    %c0_i32_1 = arith.constant 0 : i32
    return %c0_i32, %c0_i32_0 : i32, i32
  }
  func.func @transform_3(%arg0: i32) -> (i32, i32) {
    %c0_i32 = arith.constant 0 : i32
    %c0_i32_0 = arith.constant 0 : i32
    return %arg0, %c0_i32 : i32, i32
  }
}

module attributes {stable_mosaic.version = 11 : i64} {
  func.func @_matmul_bias_act_kernel(%arg0: i32, %arg1: memref<16x512xbf16, #tpu.memory_space<vmem>>, %arg2: memref<512x128xbf16, #tpu.memory_space<vmem>>, %arg3: memref<1x128xf32, #tpu.memory_space<vmem>>, %arg4: memref<16x128xf32, #tpu.memory_space<vmem>>) attributes {dimension_semantics = [#tpu.dimension_semantics<parallel>], iteration_bounds = array<i64: 1>, scalar_prefetch = 0 : i64, scratch_operands = 0 : i64, tpu.core_type = #tpu.core_type<tc>, window_params = [{transform_indices = @transform_0, window_bounds = array<i64: 16, 512>}, {pipeline_mode = #tpu.pipeline_mode<synchronous>, transform_indices = @transform_1, window_bounds = array<i64: 512, 128>}, {pipeline_mode = #tpu.pipeline_mode<synchronous>, transform_indices = @transform_2, window_bounds = array<i64: 1, 128>}, {transform_indices = @transform_3, window_bounds = array<i64: 16, 128>}]} {
    %c0 = arith.constant 0 : index
    %c0_0 = arith.constant 0 : index
    %0 = vector.load %arg1[%c0, %c0_0] : memref<16x512xbf16, #tpu.memory_space<vmem>>, vector<16x512xbf16>
    %c0_1 = arith.constant 0 : index
    %c0_2 = arith.constant 0 : index
    %1 = vector.load %arg2[%c0_1, %c0_2] : memref<512x128xbf16, #tpu.memory_space<vmem>>, vector<512x128xbf16>
    %cst = arith.constant dense<0.000000e+00> : vector<16x128xf32>
    %2 = tpu.matmul %0, %1, %cst {dimension_numbers = #tpu.dot_dimension_numbers<[1], [0], [0], [1], [0, 0, 1, 1], [], []>} : vector<16x512xbf16>, vector<512x128xbf16>, vector<16x128xf32> -> vector<16x128xf32>
    %c0_3 = arith.constant 0 : index
    %c0_4 = arith.constant 0 : index
    %3 = vector.load %arg3[%c0_3, %c0_4] : memref<1x128xf32, #tpu.memory_space<vmem>>, vector<1x128xf32>
    %4 = vector.broadcast %3 : vector<1x128xf32> to vector<16x128xf32>
    %5 = arith.addf %2, %4 : vector<16x128xf32>
    %c0_5 = arith.constant 0 : index
    %c0_6 = arith.constant 0 : index
    %6 = vector.load %arg4[%c0_5, %c0_6] : memref<16x128xf32, #tpu.memory_space<vmem>>, vector<16x128xf32>
    tpu.vector_store %arg4[%c0_5, %c0_6], %5 {strides = array<i32>} : memref<16x128xf32, #tpu.memory_space<vmem>>, vector<16x128xf32>,
    return
  }
  func.func @transform_0(%arg0: i32) -> (i32, i32) {
    %c0_i32 = arith.constant 0 : i32
    %c0_i32_0 = arith.constant 0 : i32
    return %arg0, %c0_i32 : i32, i32
  }
  func.func @transform_1(%arg0: i32) -> (i32, i32) {
    %c0_i32 = arith.constant 0 : i32
    %c0_i32_0 = arith.constant 0 : i32
    %c0_i32_1 = arith.constant 0 : i32
    return %c0_i32, %c0_i32_0 : i32, i32
  }
  func.func @transform_2(%arg0: i32) -> (i32, i32) {
    %c0_i32 = arith.constant 0 : i32
    %c0_i32_0 = arith.constant 0 : i32
    %c0_i32_1 = arith.constant 0 : i32
    return %c0_i32, %c0_i32_0 : i32, i32
  }
  func.func @transform_3(%arg0: i32) -> (i32, i32) {
    %c0_i32 = arith.constant 0 : i32
    %c0_i32_0 = arith.constant 0 : i32
    return %arg0, %c0_i32 : i32, i32
  }
}

</mosaic_0001>

<bundles_post_ra>
// kernel: teacher_forward.4
= control target key start
LH: loop header
LB: loop body
LE: loop exit
PB: predicated region body
PF: predicated region fallthrough
CT: control target
= control target key end

     0   :  { %v428_v0 = vmov 0.0   ;;  %vm429_vm0 = vmmov 0   ;;  %vm87_vm1 = vcmask 261120   ;;  %s531_s1 = inlined_call_operand.vmem [shape: bf16[32,128], index: 1, kind: input, shape index: {}]   ;;  %s532_s0 = inlined_call_operand.vmem [shape: bf16[112,32], index: 0, kind: input, shape index: {}]   ;;  %s533_s2 = inlined_call_operand.vmem [shape: f32[1,128], index: 2, kind: input, shape index: {}]   ;;  %s534_s3 = inlined_call_operand.vmem [shape: bf16[112,128], index: 3, kind: output, shape index: {}]  }
   0x1   :  { %381 = vmatprep.subr.bf16.mxu0 %v428_v0  ;;  %v419_v1 = vld [vmem:[%s531_s1] sm:$0xff]   ;;  %413 = vmatprep.subr.bf16.mxu1 %v428_v0  ;;  %v420_v2 = vld [vmem:[%s531_s1 + $0x8] sm:$0xff]   ;;  %v425_v7 = vld [vmem:[%s532_s0 + $0x10] sm:$0xff]  }
   0x2   :  { %385 = vmatprep.mubr.msk.bf16.mxu0 %vm429_vm0, %v428_v0  ;;  %401 = vmatprep.mubr.msk.bf16.mxu1 %vm429_vm0, %v428_v0  ;;  %v421_v3 = vld [vmem:[%s532_s0] sm:$0xff]   ;;  %v423_v5 = vld [vmem:[%s532_s0 + $0x8] sm:$0xff]   ;;  %v426_v8 = vld [vmem:[%s532_s0 + $0x30] sm:$0xff]  }
   0x3   :  { %382 = vmatpush3.bf16.msra.mxu0 %v419_v1  ;;  %415 = vmatpush3.bf16.msra.mxu1 %v419_v1  ;;  %v422_v4 = vld [vmem:[%s532_s0 + $0x20] sm:$0xff]   ;;  %v424_v6 = vld [vmem:[%s532_s0 + $0x28] sm:$0xff]   ;;  %v427_v9 = vld [vmem:[%s532_s0 + $0x18] sm:$0xff]  }
   0x4   :  { %383 = vmatprep.subr.bf16.mxu0 %v428_v0  ;;  %414 = vmatprep.subr.bf16.mxu1 %v428_v0  ;;  %v494_v10 = vld [vmem:[%s533_s2] ss:$0 sm:$0xff] }
   0x7   :  { %384 = vmatpush3.bf16.msra.mxu0 %v420_v2  ;;  %416 = vmatpush3.bf16.msra.mxu1 %v420_v2 }
   0xa   :  { %386 = vmatmul.mubr.msk.bf16.vlgmr.msra.gmra.mrb[0].mxu0 %vm87_vm1, %v421_v3  ;;  %402 = vmatmul.mubr.msk.bf16.vlgmr.msra.gmra.mrb[0].mxu1 %vm87_vm1, %v422_v4 }
   0xb   :  { %389 = vmatprep.mubr.msk.bf16.mxu0 %vm429_vm0, %v428_v0  ;;  %405 = vmatprep.mubr.msk.bf16.mxu1 %vm429_vm0, %v428_v0 }
  0x12   :  { %390 = vmatmul.mubr.msk.bf16.gmra.mrb[4].mxu0 %vm87_vm1, %v423_v5  ;;  %406 = vmatmul.mubr.msk.bf16.gmra.mrb[4].mxu1 %vm87_vm1, %v424_v6 }
  0x13   :  { %393 = vmatprep.mubr.msk.bf16.mxu0 %vm429_vm0, %v428_v0  ;;  %409 = vmatprep.mubr.msk.bf16.mxu1 %vm429_vm0, %v428_v0 }
  0x1a   :  { %394 = vmatmul.mubr.msk.bf16.gmra.mrb[8].mxu0 %vm87_vm1, %v425_v7  ;;  %410 = vmatmul.mubr.msk.bf16.gmra.mrb[8].mxu1 %vm87_vm1, %v426_v8 }
  0x1b   :  { %397 = vmatprep.mubr.msk.bf16.mxu0 %vm429_vm0, %v428_v0 }
  0x22   :  { %398 = vmatmul.mubr.msk.bf16.gmra.mrb[12].mxu0 %vm87_vm1, %v427_v9 }
  0xdd   :  { %v143_v11 = vpop.f32.mrb[0].mxu0  ;;  %v175_v12 = vpop.f32.mrb[0].mxu1 }
  0xde   :  { %v144_v13 = vadd.f32 %v494_v10, %v143_v11  ;;  %v387_v14 = vpop.f32.mrb[1].mxu0  ;;  %v176_v15 = vadd.f32 %v494_v10, %v175_v12  ;;  %v403_v16 = vpop.f32.mrb[1].mxu1 }
  0xdf   :  { %v146_v17 = vpop.f32.mrb[2].mxu0  ;;  %v178_v18 = vpop.f32.mrb[2].mxu1 }
  0xe0   :  { %v147_v19 = vadd.f32 %v494_v10, %v146_v17  ;;  %v388_v20 = vpop.f32.mrb[3].mxu0  ;;  %v206_v21 = vmax.f32 %v176_v15, 0.0  ;;  %v179_v22 = vadd.f32 %v494_v10, %v178_v18  ;;  %v404_v23 = vpop.f32.mrb[3].mxu1  ;;  %v198_v24 = vmax.f32 %v144_v13, 0.0 }
  0xe2   :  { %v199_v25 = vmax.f32 %v147_v19, 0.0  ;;  %v207_v26 = vmax.f32 %v179_v22, 0.0 }
  0xe4   :  { %v334_v27 = vpack.c.bf16 %v199_v25, %v198_v24  ;;  %v354_v28 = vpack.c.bf16 %v207_v26, %v206_v21 }
  0xe5   :  { %v151_v29 = vpop.f32.mrb[4].mxu0  ;;  %v183_v30 = vpop.f32.mrb[4].mxu1 }
  0xe6   :  { %335 = vst [vmem:[%s534_s3] sm:$0xff] %v334_v27   ;;  %369 = vst [vmem:[%s534_s3 + $0x20] sm:$0xff] %v354_v28   ;;  %v152_v31 = vadd.f32 %v494_v10, %v151_v29  ;;  %v391_v32 = vpop.f32.mrb[5].mxu0  ;;  %v184_v33 = vadd.f32 %v494_v10, %v183_v30  ;;  %v407_v34 = vpop.f32.mrb[5].mxu1 }
  0xe7   :  { %v154_v35 = vpop.f32.mrb[6].mxu0  ;;  %v186_v36 = vpop.f32.mrb[6].mxu1 }
  0xe8   :  { %v155_v37 = vadd.f32 %v494_v10, %v154_v35  ;;  %v392_v38 = vpop.f32.mrb[7].mxu0  ;;  %v208_v39 = vmax.f32 %v184_v33, 0.0  ;;  %v187_v40 = vadd.f32 %v494_v10, %v186_v36  ;;  %v408_v41 = vpop.f32.mrb[7].mxu1  ;;  %v200_v42 = vmax.f32 %v152_v31, 0.0 }
  0xea   :  { %v201_v43 = vmax.f32 %v155_v37, 0.0  ;;  %v209_v44 = vmax.f32 %v187_v40, 0.0 }
  0xec   :  { %v339_v45 = vpack.c.bf16 %v201_v43, %v200_v42  ;;  %v359_v46 = vpack.c.bf16 %v209_v44, %v208_v39 }
  0xed   :  { %v159_v47 = vpop.f32.mrb[8].mxu0  ;;  %v191_v48 = vpop.f32.mrb[8].mxu1 }
  0xee   :  { %366 = vst [vmem:[%s534_s3 + $0x8] sm:$0xff] %v339_v45   ;;  %370 = vst [vmem:[%s534_s3 + $0x28] sm:$0xff] %v359_v46   ;;  %v160_v49 = vadd.f32 %v494_v10, %v159_v47  ;;  %v395_v50 = vpop.f32.mrb[9].mxu0  ;;  %v192_v51 = vadd.f32 %v494_v10, %v191_v48  ;;  %v411_v52 = vpop.f32.mrb[9].mxu1 }
  0xef   :  { %v162_v53 = vpop.f32.mrb[10].mxu0  ;;  %v194_v54 = vpop.f32.mrb[10].mxu1 }
  0xf0   :  { %v163_v55 = vadd.f32 %v494_v10, %v162_v53  ;;  %v396_v56 = vpop.f32.mrb[11].mxu0  ;;  %v210_v57 = vmax.f32 %v192_v51, 0.0  ;;  %v195_v58 = vadd.f32 %v494_v10, %v194_v54  ;;  %v412_v59 = vpop.f32.mrb[11].mxu1  ;;  %v202_v60 = vmax.f32 %v160_v49, 0.0 }
  0xf2   :  { %v203_v61 = vmax.f32 %v163_v55, 0.0  ;;  %v211_v62 = vmax.f32 %v195_v58, 0.0 }
  0xf4   :  { %v344_v63 = vpack.c.bf16 %v203_v61, %v202_v60  ;;  %v364_v0 = vpack.c.bf16 %v211_v62, %v210_v57 }
  0xf5   :  { %v167_v1 = vpop.f32.mrb[12].mxu0 }
  0xf6   :  { %367 = vst [vmem:[%s534_s3 + $0x10] sm:$0xff] %v344_v63   ;;  %371 = vst [vmem:[%s534_s3 + $0x30] sm:$0xff] %v364_v0   ;;  %v168_v2 = vadd.f32 %v494_v10, %v167_v1  ;;  %v399_v3 = vpop.f32.mrb[13].mxu0 }
  0xf7   :  { %v170_v4 = vpop.f32.mrb[14].mxu0 }
  0xf8   :  { %v171_v5 = vadd.f32 %v494_v10, %v170_v4  ;;  %v400_v6 = vpop.f32.mrb[15].mxu0  ;;  %v204_v7 = vmax.f32 %v168_v2, 0.0 }
  0xfa   :  { %v205_v8 = vmax.f32 %v171_v5, 0.0 }
  0xfc   :  { %v349_v9 = vpack.c.bf16 %v205_v8, %v204_v7 }
  0xfe   :  { %368 = vst [vmem:[%s534_s3 + $0x18] sm:$0xff] %v349_v9  }

// kernel: teacher_forward.6
= control target key start
LH: loop header
LB: loop body
LE: loop exit
PB: predicated region body
PF: predicated region fallthrough
CT: control target
= control target key end

     0   :  { %s662_s1 = inlined_call_operand.vmem [shape: bf16[512,128], index: 1, kind: input, shape index: {}]   ;;  %s663_s0 = inlined_call_operand.vmem [shape: bf16[16,512], index: 0, kind: input, shape index: {}]   ;;  %s664_s2 = inlined_call_operand.vmem [shape: f32[1,128], index: 2, kind: input, shape index: {}]   ;;  %s665_s3 = inlined_call_operand.vmem [shape: bf16[16,128], index: 3, kind: output, shape index: {}]  }
   0x1   :  { %v490_v0 = vld [vmem:[%s662_s1 + $0x40] sm:$0xff]   ;;  %v494_v4 = vld [vmem:[%s662_s1 + $0x48] sm:$0xff]   ;;  %v498_v8 = vld [vmem:[%s662_s1 + $0x50] sm:$0xff]  }
   0x2   :  { %v491_v1 = vld [vmem:[%s662_s1 + $0xc0] sm:$0xff]   ;;  %446 = vmatprep.subr.bf16.mxu0 %v490_v0  ;;  %v495_v5 = vld [vmem:[%s662_s1 + $0xc8] sm:$0xff]   ;;  %v499_v9 = vld [vmem:[%s662_s1 + $0xd0] sm:$0xff]  }
   0x3   :  { %v492_v2 = vld [vmem:[%s662_s1] sm:$0xff]   ;;  %468 = vmatprep.subr.bf16.mxu1 %v491_v1  ;;  %v496_v6 = vld [vmem:[%s662_s1 + $0x8] sm:$0xff]   ;;  %v500_v10 = vld [vmem:[%s662_s1 + $0x10] sm:$0xff]  }
   0x4   :  { %v493_v3 = vld [vmem:[%s662_s1 + $0x80] sm:$0xff]   ;;  %447 = vmatpush3.bf16.msra.mxu0 %v492_v2  ;;  %v497_v7 = vld [vmem:[%s662_s1 + $0x88] sm:$0xff]   ;;  %v501_v11 = vld [vmem:[%s662_s1 + $0x90] sm:$0xff]  }
   0x5   :  { %469 = vmatpush3.bf16.msra.mxu1 %v493_v3  ;;  %448 = vmatprep.subr.bf16.mxu0 %v494_v4  ;;  %v502_v12 = vld [vmem:[%s662_s1 + $0x58] sm:$0xff]   ;;  %v506_v16 = vld [vmem:[%s662_s1 + $0x60] sm:$0xff]   ;;  %v510_v20 = vld [vmem:[%s662_s1 + $0x68] sm:$0xff]  }
   0x6   :  { %470 = vmatprep.subr.bf16.mxu1 %v495_v5  ;;  %v503_v13 = vld [vmem:[%s662_s1 + $0xd8] sm:$0xff]   ;;  %v507_v17 = vld [vmem:[%s662_s1 + $0xe0] sm:$0xff]   ;;  %v511_v21 = vld [vmem:[%s662_s1 + $0xe8] sm:$0xff]  }
   0x7   :  { %v504_v14 = vld [vmem:[%s662_s1 + $0x18] sm:$0xff]   ;;  %v508_v18 = vld [vmem:[%s662_s1 + $0x20] sm:$0xff]   ;;  %v512_v22 = vld [vmem:[%s662_s1 + $0x28] sm:$0xff]  }
   0x8   :  { %449 = vmatpush3.bf16.msra.mxu0 %v496_v6  ;;  %v505_v15 = vld [vmem:[%s662_s1 + $0x98] sm:$0xff]   ;;  %v509_v19 = vld [vmem:[%s662_s1 + $0xa0] sm:$0xff]   ;;  %v513_v23 = vld [vmem:[%s662_s1 + $0xa8] sm:$0xff]  }
   0x9   :  { %471 = vmatpush3.bf16.msra.mxu1 %v497_v7  ;;  %450 = vmatprep.subr.bf16.mxu0 %v498_v8  ;;  %v514_v24 = vld [vmem:[%s662_s1 + $0x70] sm:$0xff]   ;;  %v518_v28 = vld [vmem:[%s662_s1 + $0x78] sm:$0xff]   ;;  %v400_v38 = vld [vmem:[%s664_s2] ss:$0 sm:$0xff] }
   0xa   :  { %472 = vmatprep.subr.bf16.mxu1 %v499_v9  ;;  %v515_v25 = vld [vmem:[%s662_s1 + $0xf0] sm:$0xff]   ;;  %v519_v29 = vld [vmem:[%s662_s1 + $0xf8] sm:$0xff]  }
   0xb   :  { %v516_v26 = vld [vmem:[%s662_s1 + $0x30] sm:$0xff]   ;;  %v520_v30 = vld [vmem:[%s662_s1 + $0x38] sm:$0xff]  }
   0xc   :  { %451 = vmatpush3.bf16.msra.mxu0 %v500_v10  ;;  %v517_v27 = vld [vmem:[%s662_s1 + $0xb0] sm:$0xff]   ;;  %v521_v31 = vld [vmem:[%s662_s1 + $0xb8] sm:$0xff]  }
   0xd   :  { %473 = vmatpush3.bf16.msra.mxu1 %v501_v11  ;;  %452 = vmatprep.subr.bf16.mxu0 %v502_v12  ;;  %v522_v32 = vld [vmem:[%s663_s0] ss:$16 sps:$4 sm:$0xff]   ;;  %v524_v33 = vld [vmem:[%s663_s0 + $0x4] ss:$16 sps:$4 sm:$0xff]   ;;  %v525_v34 = vld [vmem:[%s663_s0 + $0x8] ss:$16 sps:$4 sm:$0xff]  }
   0xe   :  { %474 = vmatprep.subr.bf16.mxu1 %v503_v13  ;;  %v527_v35 = vld [vmem:[%s663_s0 + $0xc] ss:$16 sps:$4 sm:$0xff]   ;;  %334 = vmatprep.mubr.bf16.mxu0 %v524_v33 }
   0xf   :  { %375 = vmatprep.mubr.bf16.mxu1 %v527_v35 }
  0x10   :  { %453 = vmatpush3.bf16.msra.mxu0 %v504_v14 }
  0x11   :  { %475 = vmatpush3.bf16.msra.mxu1 %v505_v15  ;;  %454 = vmatprep.subr.bf16.mxu0 %v506_v16 }
  0x12   :  { %476 = vmatprep.subr.bf16.mxu1 %v507_v17 }
  0x14   :  { %455 = vmatpush3.bf16.msra.mxu0 %v508_v18 }
  0x15   :  { %477 = vmatpush3.bf16.msra.mxu1 %v509_v19  ;;  %456 = vmatprep.subr.bf16.mxu0 %v510_v20 }
  0x16   :  { %478 = vmatprep.subr.bf16.mxu1 %v511_v21 }
  0x18   :  { %457 = vmatpush3.bf16.msra.mxu0 %v512_v22 }
  0x19   :  { %479 = vmatpush3.bf16.msra.mxu1 %v513_v23  ;;  %458 = vmatprep.subr.bf16.mxu0 %v514_v24 }
  0x1a   :  { %480 = vmatprep.subr.bf16.mxu1 %v515_v25 }
  0x1c   :  { %459 = vmatpush3.bf16.msra.mxu0 %v516_v26 }
  0x1d   :  { %481 = vmatpush3.bf16.msra.mxu1 %v517_v27  ;;  %460 = vmatprep.subr.bf16.mxu0 %v518_v28 }
  0x1e   :  { %482 = vmatprep.subr.bf16.mxu1 %v519_v29 }
  0x20   :  { %461 = vmatpush3.bf16.msra.mxu0 %v520_v30 }
  0x21   :  { %483 = vmatpush3.bf16.msra.mxu1 %v521_v31 }
  0x23   :  { %335 = vmatmul.mubr.bf16.vlgmr.msra.gmra.mrb[0].mxu0 %v522_v32 }
  0x24   :  { %376 = vmatmul.mubr.bf16.vlgmr.msra.gmra.mrb[0].mxu1 %v525_v34 }
  0xf6   :  { %v462_v36 = vpop.f32.mrb[0].mxu0 }
  0xf7   :  { %v484_v37 = vpop.f32.mrb[0].mxu1  ;;  %v463_v39 = vpop.f32.mrb[1].mxu0 }
  0xf8   :  { %v464_v40 = vadd.f32 %v463_v39, %v462_v36  ;;  %v485_v41 = vpop.f32.mrb[1].mxu1  ;;  %v465_v42 = vpop.f32.mrb[2].mxu0 }
  0xf9   :  { %v486_v43 = vadd.f32 %v485_v41, %v484_v37  ;;  %v487_v44 = vpop.f32.mrb[2].mxu1  ;;  %v466_v45 = vpop.f32.mrb[3].mxu0 }
  0xfa   :  { %v337_v46 = vadd.f32 %v464_v40, %v400_v38  ;;  %v467_v47 = vadd.f32 %v466_v45, %v465_v42  ;;  %v488_v48 = vpop.f32.mrb[3].mxu1 }
  0xfb   :  { %v489_v49 = vadd.f32 %v488_v48, %v487_v44 }
  0xfc   :  { %v378_v50 = vadd.f32 %v486_v43, %v337_v46  ;;  %v340_v51 = vadd.f32 %v467_v47, %v400_v38 }
  0xfe   :  { %v381_v52 = vadd.f32 %v489_v49, %v340_v51  ;;  %v384_v53 = vmax.f32 %v378_v50, 0.0 }
 0x100   :  { %v385_v54 = vmax.f32 %v381_v52, 0.0 }
 0x102   :  { %v444_v55 = vpack.c.bf16 %v385_v54, %v384_v53 }
 0x104   :  { %445 = vst [vmem:[%s665_s3] sm:$0xff] %v444_v55  }

// kernel: teacher_forward.5
= control target key start
LH: loop header
LB: loop body
LE: loop exit
PB: predicated region body
PF: predicated region fallthrough
CT: control target
= control target key end

     0   :  { %s1632_s1 = inlined_call_operand.vmem [shape: bf16[1152,128], index: 1, kind: input, shape index: {}]   ;;  %s1633_s0 = inlined_call_operand.vmem [shape: bf16[32,1152], index: 0, kind: input, shape index: {}]   ;;  %s1634_s2 = inlined_call_operand.vmem [shape: f32[1,128], index: 2, kind: input, shape index: {}]   ;;  %s1635_s3 = inlined_call_operand.vmem [shape: bf16[32,128], index: 3, kind: output, shape index: {}]  }
   0x1   :  { %v1235_v0 = vld [vmem:[%s1632_s1 + $0x40] sm:$0xff]   ;;  %v1239_v4 = vld [vmem:[%s1632_s1 + $0x48] sm:$0xff]   ;;  %v1243_v8 = vld [vmem:[%s1632_s1 + $0x50] sm:$0xff]  }
   0x2   :  { %v1236_v1 = vld [vmem:[%s1632_s1] sm:$0xff]   ;;  %1093 = vmatprep.subr.bf16.mxu0 %v1235_v0  ;;  %v1240_v5 = vld [vmem:[%s1632_s1 + $0x8] sm:$0xff]   ;;  %v1244_v9 = vld [vmem:[%s1632_s1 + $0x10] sm:$0xff]  }
   0x3   :  { %v1237_v2 = vld [vmem:[%s1632_s1 + $0xc0] sm:$0xff]   ;;  %1094 = vmatpush3.bf16.msra.mxu0 %v1236_v1  ;;  %v1241_v6 = vld [vmem:[%s1632_s1 + $0xc8] sm:$0xff]   ;;  %v1245_v10 = vld [vmem:[%s1632_s1 + $0xd0] sm:$0xff]  }
   0x4   :  { %v1238_v3 = vld [vmem:[%s1632_s1 + $0x80] sm:$0xff]   ;;  %1121 = vmatprep.subr.bf16.mxu1 %v1237_v2  ;;  %1095 = vmatprep.subr.bf16.mxu0 %v1239_v4  ;;  %v1242_v7 = vld [vmem:[%s1632_s1 + $0x88] sm:$0xff]   ;;  %v1246_v11 = vld [vmem:[%s1632_s1 + $0x90] sm:$0xff]  }
   0x5   :  { %1122 = vmatpush3.bf16.msra.mxu1 %v1238_v3  ;;  %v1247_v12 = vld [vmem:[%s1632_s1 + $0x58] sm:$0xff]   ;;  %v1251_v16 = vld [vmem:[%s1632_s1 + $0x60] sm:$0xff]   ;;  %v1255_v20 = vld [vmem:[%s1632_s1 + $0x68] sm:$0xff]  }
   0x6   :  { %1123 = vmatprep.subr.bf16.mxu1 %v1241_v6  ;;  %v1248_v13 = vld [vmem:[%s1632_s1 + $0x18] sm:$0xff]   ;;  %v1252_v17 = vld [vmem:[%s1632_s1 + $0x20] sm:$0xff]   ;;  %v1256_v21 = vld [vmem:[%s1632_s1 + $0x28] sm:$0xff]  }
   0x7   :  { %1096 = vmatpush3.bf16.msra.mxu0 %v1240_v5  ;;  %v1249_v14 = vld [vmem:[%s1632_s1 + $0xd8] sm:$0xff]   ;;  %v1253_v18 = vld [vmem:[%s1632_s1 + $0xe0] sm:$0xff]   ;;  %v1257_v22 = vld [vmem:[%s1632_s1 + $0xe8] sm:$0xff]  }
   0x8   :  { %1097 = vmatprep.subr.bf16.mxu0 %v1243_v8  ;;  %v1250_v15 = vld [vmem:[%s1632_s1 + $0x98] sm:$0xff]   ;;  %v1254_v19 = vld [vmem:[%s1632_s1 + $0xa0] sm:$0xff]   ;;  %v1258_v23 = vld [vmem:[%s1632_s1 + $0xa8] sm:$0xff]  }
   0x9   :  { %1124 = vmatpush3.bf16.msra.mxu1 %v1242_v7  ;;  %v1259_v24 = vld [vmem:[%s1632_s1 + $0x70] sm:$0xff]   ;;  %v1263_v28 = vld [vmem:[%s1632_s1 + $0x78] sm:$0xff]   ;;  %v1266_v31 = vld [vmem:[%s1633_s0] ss:$36 sps:$4 sm:$0xff]  }
   0xa   :  { %1125 = vmatprep.subr.bf16.mxu1 %v1245_v10  ;;  %v1260_v25 = vld [vmem:[%s1632_s1 + $0x30] sm:$0xff]   ;;  %v1264_v29 = vld [vmem:[%s1632_s1 + $0x38] sm:$0xff]   ;;  %v1268_v32 = vld [vmem:[%s1633_s0 + $0x4] ss:$36 sps:$4 sm:$0xff]  }
   0xb   :  { %1098 = vmatpush3.bf16.msra.mxu0 %v1244_v9  ;;  %v1261_v26 = vld [vmem:[%s1632_s1 + $0xf0] sm:$0xff]   ;;  %v1265_v30 = vld [vmem:[%s1632_s1 + $0xf8] sm:$0xff]   ;;  %742 = vmatprep.mubr.bf16.mxu0 %v1268_v32  ;;  %v1270_v34 = vld [vmem:[%s1632_s1 + $0x140] sm:$0xff]  }
   0xc   :  { %1099 = vmatprep.subr.bf16.mxu0 %v1247_v12  ;;  %v1262_v27 = vld [vmem:[%s1632_s1 + $0xb0] sm:$0xff]   ;;  %v1269_v33 = vld [vmem:[%s1632_s1 + $0xb8] sm:$0xff]   ;;  %v1271_v35 = vld [vmem:[%s1633_s0 + $0x8] ss:$36 sps:$4 sm:$0xff]  }
   0xd   :  { %1126 = vmatpush3.bf16.msra.mxu1 %v1246_v11  ;;  %v1273_v36 = vld [vmem:[%s1633_s0 + $0xc] ss:$36 sps:$4 sm:$0xff]   ;;  %v1274_v37 = vld [vmem:[%s1632_s1 + $0x100] sm:$0xff]   ;;  %v1285_v48 = vld [vmem:[%s1632_s1 + $0x158] sm:$0xff]  }
   0xe   :  { %1127 = vmatprep.subr.bf16.mxu1 %v1249_v14  ;;  %791 = vmatprep.mubr.bf16.mxu1 %v1273_v36  ;;  %v1275_v38 = vld [vmem:[%s1632_s1 + $0x1c0] sm:$0xff]   ;;  %v1277_v40 = vld [vmem:[%s1632_s1 + $0x148] sm:$0xff]   ;;  %v1281_v44 = vld [vmem:[%s1632_s1 + $0x150] sm:$0xff]  }
   0xf   :  { %1100 = vmatpush3.bf16.msra.mxu0 %v1248_v13  ;;  %v1276_v39 = vld [vmem:[%s1632_s1 + $0x180] sm:$0xff]   ;;  %v1278_v41 = vld [vmem:[%s1632_s1 + $0x108] sm:$0xff]   ;;  %v1282_v45 = vld [vmem:[%s1632_s1 + $0x110] sm:$0xff]  }
  0x10   :  { %1101 = vmatprep.subr.bf16.mxu0 %v1251_v16  ;;  %v1279_v42 = vld [vmem:[%s1632_s1 + $0x1c8] sm:$0xff]   ;;  %v1283_v46 = vld [vmem:[%s1632_s1 + $0x1d0] sm:$0xff]   ;;  %v1286_v49 = vld [vmem:[%s1632_s1 + $0x118] sm:$0xff]  }
  0x11   :  { %1128 = vmatpush3.bf16.msra.mxu1 %v1250_v15  ;;  %v1280_v43 = vld [vmem:[%s1632_s1 + $0x188] sm:$0xff]   ;;  %v1284_v47 = vld [vmem:[%s1632_s1 + $0x190] sm:$0xff]   ;;  %v1287_v50 = vld [vmem:[%s1632_s1 + $0x1d8] sm:$0xff]  }
  0x12   :  { %1129 = vmatprep.subr.bf16.mxu1 %v1253_v18  ;;  %v1288_v51 = vld [vmem:[%s1632_s1 + $0x198] sm:$0xff]   ;;  %v1289_v52 = vld [vmem:[%s1632_s1 + $0x160] sm:$0xff]   ;;  %v1293_v56 = vld [vmem:[%s1632_s1 + $0x168] sm:$0xff]  }
  0x13   :  { %1102 = vmatpush3.bf16.msra.mxu0 %v1252_v17  ;;  %v1290_v53 = vld [vmem:[%s1632_s1 + $0x120] sm:$0xff]   ;;  %v1294_v57 = vld [vmem:[%s1633_s0 + $0x4c] ss:$36 sps:$4 sm:$0xff]   ;;  %v1299_v61 = vld [vmem:[%s1633_s0 + $0x54] ss:$36 sps:$4 sm:$0xff]  }
  0x14   :  { %1103 = vmatprep.subr.bf16.mxu0 %v1255_v20  ;;  %v1291_v54 = vld [vmem:[%s1632_s1 + $0x1e0] sm:$0xff]   ;;  %v1296_v58 = vld [vmem:[%s1632_s1 + $0x128] sm:$0xff]   ;;  %v1302_v63 = vld [vmem:[%s1633_s0 + $0x50] ss:$36 sps:$4 sm:$0xff]  }
  0x15   :  { %1130 = vmatpush3.bf16.msra.mxu1 %v1254_v19  ;;  %v1292_v55 = vld [vmem:[%s1632_s1 + $0x1a0] sm:$0xff]   ;;  %v1297_v59 = vld [vmem:[%s1633_s0 + $0x48] ss:$36 sps:$4 sm:$0xff]   ;;  %v1303_v0 = vld [vmem:[%s1632_s1 + $0x170] sm:$0xff]  }
  0x16   :  { %1131 = vmatprep.subr.bf16.mxu1 %v1257_v22  ;;  %v1298_v60 = vld [vmem:[%s1632_s1 + $0x1e8] sm:$0xff]   ;;  %v1304_v1 = vld [vmem:[%s1632_s1 + $0x130] sm:$0xff]   ;;  %v1307_v4 = vld [vmem:[%s1632_s1 + $0x178] sm:$0xff]  }
  0x17   :  { %1104 = vmatpush3.bf16.msra.mxu0 %v1256_v21  ;;  %v1301_v62 = vld [vmem:[%s1632_s1 + $0x1a8] sm:$0xff]   ;;  %v1305_v2 = vld [vmem:[%s1632_s1 + $0x1f0] sm:$0xff]   ;;  %v1308_v5 = vld [vmem:[%s1632_s1 + $0x138] sm:$0xff]  }
  0x18   :  { %1105 = vmatprep.subr.bf16.mxu0 %v1259_v24  ;;  %v1306_v3 = vld [vmem:[%s1632_s1 + $0x1b0] sm:$0xff]   ;;  %v1309_v6 = vld [vmem:[%s1632_s1 + $0x1f8] sm:$0xff]   ;;  %v1314_v10 = vld [vmem:[%s1632_s1 + $0x200] sm:$0xff]  }
  0x19   :  { %1132 = vmatpush3.bf16.msra.mxu1 %v1258_v23  ;;  %v1310_v7 = vld [vmem:[%s1633_s0 + $0x10] ss:$36 sps:$4 sm:$0xff]   ;;  %v1313_v9 = vld [vmem:[%s1632_s1 + $0x1b8] sm:$0xff]   ;;  %v1318_v13 = vld [vmem:[%s1632_s1 + $0x208] sm:$0xff]  }
  0x1a   :  { %1133 = vmatprep.subr.bf16.mxu1 %v1261_v26  ;;  %v1312_v8 = vld [vmem:[%s1633_s0 + $0x14] ss:$36 sps:$4 sm:$0xff]   ;;  %v1317_v12 = vld [vmem:[%s1633_s0 + $0x1c] ss:$36 sps:$4 sm:$0xff]   ;;  %v1323_v17 = vld [vmem:[%s1633_s0 + $0x64] ss:$36 sps:$4 sm:$0xff]  }
  0x1b   :  { %1106 = vmatpush3.bf16.msra.mxu0 %v1260_v25  ;;  %v1315_v11 = vld [vmem:[%s1633_s0 + $0x18] ss:$36 sps:$4 sm:$0xff]   ;;  %v1322_v16 = vld [vmem:[%s1632_s1 + $0x210] sm:$0xff]   ;;  %v1325_v18 = vld [vmem:[%s1633_s0 + $0x60] ss:$36 sps:$4 sm:$0xff]  }
  0x1c   :  { %1107 = vmatprep.subr.bf16.mxu0 %v1263_v28  ;;  %v1319_v14 = vld [vmem:[%s1633_s0 + $0x5c] ss:$36 sps:$4 sm:$0xff]   ;;  %v1328_v22 = vld [vmem:[%s1632_s1 + $0x228] sm:$0xff]   ;;  %v1329_v23 = vld [vmem:[%s1632_s1 + $0x230] sm:$0xff]  }
  0x1d   :  { %1134 = vmatpush3.bf16.msra.mxu1 %v1262_v27  ;;  %v1321_v15 = vld [vmem:[%s1633_s0 + $0x58] ss:$36 sps:$4 sm:$0xff]   ;;  %v1327_v20 = vld [vmem:[%s1632_s1 + $0x220] sm:$0xff]   ;;  %v1332_v25 = vld [vmem:[%s1633_s0 + $0x68] ss:$36 sps:$4 sm:$0xff]  }
  0x1e   :  { %1135 = vmatprep.subr.bf16.mxu1 %v1265_v30  ;;  %v1326_v19 = vld [vmem:[%s1632_s1 + $0x218] sm:$0xff]   ;;  %v1331_v21 = vld [vmem:[%s1633_s0 + $0x20] ss:$36 sps:$4 sm:$0xff]  }
  0x1f   :  { %1108 = vmatpush3.bf16.msra.mxu0 %v1264_v29  ;;  %v1330_v24 = vld [vmem:[%s1632_s1 + $0x238] sm:$0xff]   ;;  %v983_v27 = vld [vmem:[%s1634_s2] ss:$0 sm:$0xff] }
  0x20   :  { %1149 = vmatprep.subr.bf16.mxu0 %v1270_v34 }
  0x21   :  { %1136 = vmatpush3.bf16.msra.mxu1 %v1269_v33 }
  0x22   :  { %743 = vmatmul.mubr.bf16.vlgmr.msra.gmra.mrb[0].mxu0 %v1266_v31  ;;  %1177 = vmatprep.subr.bf16.mxu1 %v1275_v38 }
  0x23   :  { %1150 = vmatpush3.bf16.msra.mxu0 %v1274_v37  ;;  %750 = vmatprep.mubr.bf16.mxu0 %v1294_v57 }
  0x24   :  { %792 = vmatmul.mubr.bf16.vlgmr.msra.gmra.mrb[0].mxu1 %v1271_v35  ;;  %1151 = vmatprep.subr.bf16.mxu0 %v1277_v40 }
  0x25   :  { %1178 = vmatpush3.bf16.msra.mxu1 %v1276_v39  ;;  %799 = vmatprep.mubr.bf16.mxu1 %v1299_v61 }
  0x26   :  { %1179 = vmatprep.subr.bf16.mxu1 %v1279_v42 }
  0x27   :  { %1152 = vmatpush3.bf16.msra.mxu0 %v1278_v41 }
  0x28   :  { %1153 = vmatprep.subr.bf16.mxu0 %v1281_v44 }
  0x29   :  { %1180 = vmatpush3.bf16.msra.mxu1 %v1280_v43 }
  0x2a   :  { %1181 = vmatprep.subr.bf16.mxu1 %v1283_v46  ;;  %751 = vmatmul.mubr.bf16.gmra.mrb[4].mxu0 %v1297_v59 }
  0x2b   :  { %1154 = vmatpush3.bf16.msra.mxu0 %v1282_v45  ;;  %840 = vmatprep.mubr.bf16.mxu0 %v1312_v8 }
  0x2c   :  { %1155 = vmatprep.subr.bf16.mxu0 %v1285_v48  ;;  %800 = vmatmul.mubr.bf16.gmra.mrb[4].mxu1 %v1302_v63 }
  0x2d   :  { %1182 = vmatpush3.bf16.msra.mxu1 %v1284_v47  ;;  %889 = vmatprep.mubr.bf16.mxu1 %v1317_v12 }
  0x2e   :  { %1183 = vmatprep.subr.bf16.mxu1 %v1287_v50 }
  0x2f   :  { %1156 = vmatpush3.bf16.msra.mxu0 %v1286_v49 }
  0x30   :  { %1157 = vmatprep.subr.bf16.mxu0 %v1289_v52 }
  0x31   :  { %1184 = vmatpush3.bf16.msra.mxu1 %v1288_v51 }
  0x32   :  { %1185 = vmatprep.subr.bf16.mxu1 %v1291_v54 }
  0x33   :  { %1158 = vmatpush3.bf16.msra.mxu0 %v1290_v53 }
  0x34   :  { %1159 = vmatprep.subr.bf16.mxu0 %v1293_v56 }
  0x35   :  { %1186 = vmatpush3.bf16.msra.mxu1 %v1292_v55 }
  0x36   :  { %1187 = vmatprep.subr.bf16.mxu1 %v1298_v60 }
  0x37   :  { %1160 = vmatpush3.bf16.msra.mxu0 %v1296_v58 }
  0x38   :  { %1161 = vmatprep.subr.bf16.mxu0 %v1303_v0 }
  0x39   :  { %1188 = vmatpush3.bf16.msra.mxu1 %v1301_v62 }
  0x3a   :  { %1189 = vmatprep.subr.bf16.mxu1 %v1305_v2 }
  0x3b   :  { %1162 = vmatpush3.bf16.msra.mxu0 %v1304_v1 }
  0x3c   :  { %1163 = vmatprep.subr.bf16.mxu0 %v1307_v4 }
  0x3d   :  { %1190 = vmatpush3.bf16.msra.mxu1 %v1306_v3 }
  0x3e   :  { %1191 = vmatprep.subr.bf16.mxu1 %v1309_v6 }
  0x3f   :  { %1164 = vmatpush3.bf16.msra.mxu0 %v1308_v5 }
  0x40   :  { %1215 = vmatprep.subr.bf16.mxu0 %v1314_v10 }
  0x41   :  { %1192 = vmatpush3.bf16.msra.mxu1 %v1313_v9 }
  0x42   :  { %841 = vmatmul.mubr.bf16.vlgmr.msra.gmra.mrb[8].mxu0 %v1310_v7 }
  0x43   :  { %1216 = vmatpush3.bf16.msra.mxu0 %v1314_v10  ;;  %848 = vmatprep.mubr.bf16.mxu0 %v1319_v14 }
  0x44   :  { %890 = vmatmul.mubr.bf16.vlgmr.msra.gmra.mrb[8].mxu1 %v1315_v11  ;;  %1217 = vmatprep.subr.bf16.mxu0 %v1318_v13 }
  0x45   :  { %897 = vmatprep.mubr.bf16.mxu1 %v1323_v17 }
  0x47   :  { %1218 = vmatpush3.bf16.msra.mxu0 %v1318_v13 }
  0x48   :  { %1219 = vmatprep.subr.bf16.mxu0 %v1322_v16 }
  0x4a   :  { %849 = vmatmul.mubr.bf16.gmra.mrb[12].mxu0 %v1321_v15 }
  0x4b   :  { %1220 = vmatpush3.bf16.msra.mxu0 %v1322_v16  ;;  %1231 = vmatprep.mubr.bf16.mxu0 %v1331_v21 }
  0x4c   :  { %898 = vmatmul.mubr.bf16.gmra.mrb[12].mxu1 %v1325_v18  ;;  %1221 = vmatprep.subr.bf16.mxu0 %v1326_v19 }
  0x4f   :  { %1222 = vmatpush3.bf16.msra.mxu0 %v1326_v19 }
  0x50   :  { %1223 = vmatprep.subr.bf16.mxu0 %v1327_v20 }
  0x53   :  { %1224 = vmatpush3.bf16.msra.mxu0 %v1327_v20 }
  0x54   :  { %1225 = vmatprep.subr.bf16.mxu0 %v1328_v22 }
  0x57   :  { %1226 = vmatpush3.bf16.msra.mxu0 %v1328_v22 }
  0x58   :  { %1227 = vmatprep.subr.bf16.mxu0 %v1329_v23 }
  0x5b   :  { %1228 = vmatpush3.bf16.msra.mxu0 %v1329_v23 }
  0x5c   :  { %1229 = vmatprep.subr.bf16.mxu0 %v1330_v24 }
  0x5f   :  { %1230 = vmatpush3.bf16.msra.mxu0 %v1330_v24 }
  0x62   :  { %1232 = vmatmul.mubr.bf16.vlgmr.msra.gmra.mrb[16].mxu0 %v1332_v25 }
  0xf5   :  { %v1109_v26 = vpop.f32.mrb[0].mxu0 }
  0xf6   :  { %v1110_v28 = vpop.f32.mrb[1].mxu0 }
  0xf7   :  { %v1111_v29 = vadd.f32 %v1110_v28, %v1109_v26  ;;  %v1112_v30 = vpop.f32.mrb[2].mxu0  ;;  %v1137_v31 = vpop.f32.mrb[0].mxu1 }
  0xf8   :  { %v1113_v32 = vpop.f32.mrb[3].mxu0  ;;  %v1138_v35 = vpop.f32.mrb[1].mxu1 }
  0xf9   :  { %v745_v33 = vadd.f32 %v1111_v29, %v983_v27  ;;  %v1114_v34 = vadd.f32 %v1113_v32, %v1112_v30  ;;  %v1139_v36 = vadd.f32 %v1138_v35, %v1137_v31  ;;  %v1140_v37 = vpop.f32.mrb[2].mxu1 }
  0xfa   :  { %v1141_v39 = vpop.f32.mrb[3].mxu1 }
  0xfb   :  { %v748_v38 = vadd.f32 %v1114_v34, %v983_v27  ;;  %v794_v40 = vadd.f32 %v1139_v36, %v745_v33  ;;  %v1142_v41 = vadd.f32 %v1141_v39, %v1140_v37 }
  0xfd   :  { %v797_v42 = vadd.f32 %v1142_v41, %v748_v38  ;;  %v1115_v43 = vpop.f32.mrb[4].mxu0 }
  0xfe   :  { %v1116_v44 = vpop.f32.mrb[5].mxu0 }
  0xff   :  { %v1117_v45 = vadd.f32 %v1116_v44, %v1115_v43  ;;  %v1118_v46 = vpop.f32.mrb[6].mxu0  ;;  %v1143_v47 = vpop.f32.mrb[4].mxu1 }
 0x100   :  { %v1119_v48 = vpop.f32.mrb[7].mxu0  ;;  %v1144_v51 = vpop.f32.mrb[5].mxu1 }
 0x101   :  { %v753_v49 = vadd.f32 %v1117_v45, %v983_v27  ;;  %v1120_v50 = vadd.f32 %v1119_v48, %v1118_v46  ;;  %v1145_v52 = vadd.f32 %v1144_v51, %v1143_v47  ;;  %v1146_v53 = vpop.f32.mrb[6].mxu1 }
 0x102   :  { %v1147_v55 = vpop.f32.mrb[7].mxu1 }
 0x103   :  { %v756_v54 = vadd.f32 %v1120_v50, %v983_v27  ;;  %v802_v56 = vadd.f32 %v1145_v52, %v753_v49  ;;  %v1148_v57 = vadd.f32 %v1147_v55, %v1146_v53 }
 0x105   :  { %v805_v58 = vadd.f32 %v1148_v57, %v756_v54 }
 0x115   :  { %v1165_v59 = vpop.f32.mrb[8].mxu0 }
 0x116   :  { %v1166_v60 = vpop.f32.mrb[9].mxu0 }
 0x117   :  { %v1167_v61 = vadd.f32 %v1166_v60, %v1165_v59  ;;  %v1168_v62 = vpop.f32.mrb[10].mxu0  ;;  %v1193_v63 = vpop.f32.mrb[8].mxu1 }
 0x118   :  { %v1169_v0 = vpop.f32.mrb[11].mxu0  ;;  %v1194_v3 = vpop.f32.mrb[9].mxu1 }
 0x119   :  { %v843_v1 = vadd.f32 %v1167_v61, %v794_v40  ;;  %v1170_v2 = vadd.f32 %v1169_v0, %v1168_v62  ;;  %v1195_v4 = vadd.f32 %v1194_v3, %v1193_v63  ;;  %v1196_v5 = vpop.f32.mrb[10].mxu1 }
 0x11a   :  { %v1197_v7 = vpop.f32.mrb[11].mxu1 }
 0x11b   :  { %v846_v6 = vadd.f32 %v1170_v2, %v797_v42  ;;  %v1198_v8 = vadd.f32 %v1197_v7, %v1196_v5  ;;  %v892_v9 = vadd.f32 %v1195_v4, %v843_v1 }
 0x11d   :  { %v1171_v10 = vpop.f32.mrb[12].mxu0  ;;  %v895_v12 = vadd.f32 %v1198_v8, %v846_v6 }
 0x11e   :  { %v1172_v11 = vpop.f32.mrb[13].mxu0 }
 0x11f   :  { %v1173_v13 = vadd.f32 %v1172_v11, %v1171_v10  ;;  %v1174_v14 = vpop.f32.mrb[14].mxu0  ;;  %v1199_v15 = vpop.f32.mrb[12].mxu1 }
 0x120   :  { %v1175_v16 = vpop.f32.mrb[15].mxu0  ;;  %v1200_v19 = vpop.f32.mrb[13].mxu1 }
 0x121   :  { %v851_v17 = vadd.f32 %v1173_v13, %v802_v56  ;;  %v1176_v18 = vadd.f32 %v1175_v16, %v1174_v14  ;;  %v1201_v20 = vadd.f32 %v1200_v19, %v1199_v15  ;;  %v1202_v21 = vpop.f32.mrb[14].mxu1 }
 0x122   :  { %v1203_v23 = vpop.f32.mrb[15].mxu1 }
 0x123   :  { %v854_v22 = vadd.f32 %v1176_v18, %v805_v58  ;;  %v1204_v24 = vadd.f32 %v1203_v23, %v1202_v21  ;;  %v900_v25 = vadd.f32 %v1201_v20, %v851_v17 }
 0x125   :  { %v903_v26 = vadd.f32 %v1204_v24, %v854_v22 }
 0x135   :  { %v1233_v27 = vpop.f32.mrb[16].mxu0 }
 0x136   :  { %v949_v28 = vadd.f32 %v1233_v27, %v900_v25  ;;  %v940_v29 = vpop.f32.mrb[17].mxu0 }
 0x137   :  { %v941_v30 = vadd.f32 %v940_v29, %v892_v9  ;;  %v1234_v31 = vpop.f32.mrb[18].mxu0 }
 0x138   :  { %v952_v32 = vadd.f32 %v1234_v31, %v903_v26  ;;  %v943_v33 = vpop.f32.mrb[19].mxu0  ;;  %v957_v35 = vmax.f32 %v949_v28, 0.0 }
 0x139   :  { %v944_v34 = vadd.f32 %v943_v33, %v895_v12  ;;  %v955_v37 = vmax.f32 %v941_v30, 0.0 }
 0x13a   :  { %v958_v36 = vmax.f32 %v952_v32, 0.0 }
 0x13b   :  { %v956_v38 = vmax.f32 %v944_v34, 0.0 }
 0x13c   :  { %v1090_v39 = vpack.c.bf16 %v958_v36, %v957_v35 }
 0x13d   :  { %v1085_v40 = vpack.c.bf16 %v956_v38, %v955_v37 }
 0x13e   :  { %1092 = vst [vmem:[%s1635_s3 + $0x8] sm:$0xff] %v1090_v39  }
 0x13f   :  { %1086 = vst [vmem:[%s1635_s3] sm:$0xff] %v1085_v40  }

// kernel: teacher_forward.7
= control target key start
LH: loop header
LB: loop body
LE: loop exit
PB: predicated region body
PF: predicated region fallthrough
CT: control target
= control target key end

     0   :  { %s646_s1 = inlined_call_operand.vmem [shape: bf16[512,128], index: 1, kind: input, shape index: {}]   ;;  %s647_s0 = inlined_call_operand.vmem [shape: bf16[16,512], index: 0, kind: input, shape index: {}]   ;;  %s648_s2 = inlined_call_operand.vmem [shape: f32[1,128], index: 2, kind: input, shape index: {}]   ;;  %s649_s3 = inlined_call_operand.vmem [shape: f32[16,128], index: 3, kind: output, shape index: {}]  }
   0x1   :  { %v471_v0 = vld [vmem:[%s646_s1 + $0x40] sm:$0xff]   ;;  %v475_v4 = vld [vmem:[%s646_s1 + $0x48] sm:$0xff]   ;;  %v479_v8 = vld [vmem:[%s646_s1 + $0x50] sm:$0xff]  }
   0x2   :  { %v472_v1 = vld [vmem:[%s646_s1 + $0xc0] sm:$0xff]   ;;  %427 = vmatprep.subr.bf16.mxu0 %v471_v0  ;;  %v476_v5 = vld [vmem:[%s646_s1 + $0xc8] sm:$0xff]   ;;  %v480_v9 = vld [vmem:[%s646_s1 + $0xd0] sm:$0xff]  }
   0x3   :  { %v473_v2 = vld [vmem:[%s646_s1] sm:$0xff]   ;;  %449 = vmatprep.subr.bf16.mxu1 %v472_v1  ;;  %v477_v6 = vld [vmem:[%s646_s1 + $0x8] sm:$0xff]   ;;  %v481_v10 = vld [vmem:[%s646_s1 + $0x10] sm:$0xff]  }
   0x4   :  { %v474_v3 = vld [vmem:[%s646_s1 + $0x80] sm:$0xff]   ;;  %428 = vmatpush3.bf16.msra.mxu0 %v473_v2  ;;  %v478_v7 = vld [vmem:[%s646_s1 + $0x88] sm:$0xff]   ;;  %v482_v11 = vld [vmem:[%s646_s1 + $0x90] sm:$0xff]  }
   0x5   :  { %450 = vmatpush3.bf16.msra.mxu1 %v474_v3  ;;  %429 = vmatprep.subr.bf16.mxu0 %v475_v4  ;;  %v483_v12 = vld [vmem:[%s646_s1 + $0x58] sm:$0xff]   ;;  %v487_v16 = vld [vmem:[%s646_s1 + $0x60] sm:$0xff]   ;;  %v491_v20 = vld [vmem:[%s646_s1 + $0x68] sm:$0xff]  }
   0x6   :  { %451 = vmatprep.subr.bf16.mxu1 %v476_v5  ;;  %v484_v13 = vld [vmem:[%s646_s1 + $0xd8] sm:$0xff]   ;;  %v488_v17 = vld [vmem:[%s646_s1 + $0xe0] sm:$0xff]   ;;  %v492_v21 = vld [vmem:[%s646_s1 + $0xe8] sm:$0xff]  }
   0x7   :  { %v485_v14 = vld [vmem:[%s646_s1 + $0x18] sm:$0xff]   ;;  %v489_v18 = vld [vmem:[%s646_s1 + $0x20] sm:$0xff]   ;;  %v493_v22 = vld [vmem:[%s646_s1 + $0x28] sm:$0xff]  }
   0x8   :  { %430 = vmatpush3.bf16.msra.mxu0 %v477_v6  ;;  %v486_v15 = vld [vmem:[%s646_s1 + $0x98] sm:$0xff]   ;;  %v490_v19 = vld [vmem:[%s646_s1 + $0xa0] sm:$0xff]   ;;  %v494_v23 = vld [vmem:[%s646_s1 + $0xa8] sm:$0xff]  }
   0x9   :  { %452 = vmatpush3.bf16.msra.mxu1 %v478_v7  ;;  %431 = vmatprep.subr.bf16.mxu0 %v479_v8  ;;  %v495_v24 = vld [vmem:[%s646_s1 + $0x70] sm:$0xff]   ;;  %v499_v28 = vld [vmem:[%s646_s1 + $0x78] sm:$0xff]   ;;  %v390_v38 = vld [vmem:[%s648_s2] ss:$0 sm:$0xff] }
   0xa   :  { %453 = vmatprep.subr.bf16.mxu1 %v480_v9  ;;  %v496_v25 = vld [vmem:[%s646_s1 + $0xf0] sm:$0xff]   ;;  %v500_v29 = vld [vmem:[%s646_s1 + $0xf8] sm:$0xff]  }
   0xb   :  { %v497_v26 = vld [vmem:[%s646_s1 + $0x30] sm:$0xff]   ;;  %v501_v30 = vld [vmem:[%s646_s1 + $0x38] sm:$0xff]  }
   0xc   :  { %432 = vmatpush3.bf16.msra.mxu0 %v481_v10  ;;  %v498_v27 = vld [vmem:[%s646_s1 + $0xb0] sm:$0xff]   ;;  %v502_v31 = vld [vmem:[%s646_s1 + $0xb8] sm:$0xff]  }
   0xd   :  { %454 = vmatpush3.bf16.msra.mxu1 %v482_v11  ;;  %433 = vmatprep.subr.bf16.mxu0 %v483_v12  ;;  %v503_v32 = vld [vmem:[%s647_s0] ss:$16 sps:$4 sm:$0xff]   ;;  %v505_v33 = vld [vmem:[%s647_s0 + $0x4] ss:$16 sps:$4 sm:$0xff]   ;;  %v506_v34 = vld [vmem:[%s647_s0 + $0x8] ss:$16 sps:$4 sm:$0xff]  }
   0xe   :  { %455 = vmatprep.subr.bf16.mxu1 %v484_v13  ;;  %v508_v35 = vld [vmem:[%s647_s0 + $0xc] ss:$16 sps:$4 sm:$0xff]   ;;  %334 = vmatprep.mubr.bf16.mxu0 %v505_v33 }
   0xf   :  { %375 = vmatprep.mubr.bf16.mxu1 %v508_v35 }
  0x10   :  { %434 = vmatpush3.bf16.msra.mxu0 %v485_v14 }
  0x11   :  { %456 = vmatpush3.bf16.msra.mxu1 %v486_v15  ;;  %435 = vmatprep.subr.bf16.mxu0 %v487_v16 }
  0x12   :  { %457 = vmatprep.subr.bf16.mxu1 %v488_v17 }
  0x14   :  { %436 = vmatpush3.bf16.msra.mxu0 %v489_v18 }
  0x15   :  { %458 = vmatpush3.bf16.msra.mxu1 %v490_v19  ;;  %437 = vmatprep.subr.bf16.mxu0 %v491_v20 }
  0x16   :  { %459 = vmatprep.subr.bf16.mxu1 %v492_v21 }
  0x18   :  { %438 = vmatpush3.bf16.msra.mxu0 %v493_v22 }
  0x19   :  { %460 = vmatpush3.bf16.msra.mxu1 %v494_v23  ;;  %439 = vmatprep.subr.bf16.mxu0 %v495_v24 }
  0x1a   :  { %461 = vmatprep.subr.bf16.mxu1 %v496_v25 }
  0x1c   :  { %440 = vmatpush3.bf16.msra.mxu0 %v497_v26 }
  0x1d   :  { %462 = vmatpush3.bf16.msra.mxu1 %v498_v27  ;;  %441 = vmatprep.subr.bf16.mxu0 %v499_v28 }
  0x1e   :  { %463 = vmatprep.subr.bf16.mxu1 %v500_v29 }
  0x20   :  { %442 = vmatpush3.bf16.msra.mxu0 %v501_v30 }
  0x21   :  { %464 = vmatpush3.bf16.msra.mxu1 %v502_v31 }
  0x23   :  { %335 = vmatmul.mubr.bf16.vlgmr.msra.gmra.mrb[0].mxu0 %v503_v32 }
  0x24   :  { %376 = vmatmul.mubr.bf16.vlgmr.msra.gmra.mrb[0].mxu1 %v506_v34 }
  0xf6   :  { %v443_v36 = vpop.f32.mrb[0].mxu0 }
  0xf7   :  { %v465_v37 = vpop.f32.mrb[0].mxu1  ;;  %v444_v39 = vpop.f32.mrb[1].mxu0 }
  0xf8   :  { %v445_v40 = vadd.f32 %v444_v39, %v443_v36  ;;  %v466_v41 = vpop.f32.mrb[1].mxu1  ;;  %v446_v42 = vpop.f32.mrb[2].mxu0 }
  0xf9   :  { %v467_v43 = vadd.f32 %v466_v41, %v465_v37  ;;  %v468_v44 = vpop.f32.mrb[2].mxu1  ;;  %v447_v45 = vpop.f32.mrb[3].mxu0 }
  0xfa   :  { %v337_v46 = vadd.f32 %v445_v40, %v390_v38  ;;  %v448_v47 = vadd.f32 %v447_v45, %v446_v42  ;;  %v469_v48 = vpop.f32.mrb[3].mxu1 }
  0xfb   :  { %v470_v49 = vadd.f32 %v469_v48, %v468_v44 }
  0xfc   :  { %v378_v50 = vadd.f32 %v467_v43, %v337_v46  ;;  %v340_v51 = vadd.f32 %v448_v47, %v390_v38 }
  0xfe   :  { %384 = vst [vmem:[%s649_s3] sm:$0xff] %v378_v50  ;;  %v381_v52 = vadd.f32 %v470_v49, %v340_v51 }
 0x100   :  { %385 = vst [vmem:[%s649_s3 + $0x8] sm:$0xff] %v381_v52 }

</bundles_post_ra>
